<compile_context>
chip_gen: v7x
topology: tpu7x:2x2x1
jax: 0.10.0
libtpu: 0.0.40
codegen_flags: <defaults>
</compile_context>

<pallas_src>
import functools
import math

import jax
import jax.numpy as jnp
from jax.experimental import pallas as pl
from jax.experimental.pallas import tpu as pltpu


def image2text_gate_kernel(img_re_ref, img_im_ref, g_re_ref, g_im_ref,
                           w_ref, b_ref, o_ref, acc_ref,
                           *, inv_n, fold, c, tm, sub, slice_gate):
    k = pl.program_id(1)

    @pl.when(k == 0)
    def _init():
        acc_ref[...] = jnp.zeros_like(acc_ref)

    if slice_gate:
        # Resident full-(M, L) gate, multiple reduction steps: take this step's
        # rows.  slice_gate is only set when TM is a multiple of 8, so both the
        # start and the size are sublane-aligned.
        start = pl.multiple_of(k * tm, tm)
        g_re = g_re_ref[pl.ds(start, tm), :]
        g_im = g_im_ref[pl.ds(start, tm), :]
    else:
        # Either the gate block already equals the needed (TM, L) tile (single
        # reduction step) or the gate is streamed with block index (k, 0).
        g_re = g_re_ref[...]
        g_im = g_im_ref[...]

    # Re((a+bi)(c+di)) = a*c - b*d ; g_im already carries the minus sign.
    prod = img_re_ref[...] * g_re + img_im_ref[...] * g_im          # (TB, TM, L)

    tb = acc_ref.shape[0]
    l = acc_ref.shape[2]
    if sub == 1:
        acc_ref[...] += jnp.sum(prod, axis=1, keepdims=True)        # (TB, 1, L)
    else:
        # (TB, TM//8, 8, L): sum over axis 1 = pure vreg adds (no per-step XLU).
        acc_ref[...] += jnp.sum(prod.reshape(tb, tm // sub, sub, l), axis=1)

    @pl.when(k == pl.num_programs(1) - 1)
    def _finalize():
        acc = jnp.sum(acc_ref[...], axis=1)           # (TB, L): one sublane reduce
        pooled = acc[:, 0:c]
        for g in range(1, fold):                      # regroup fold lane groups of C
            pooled = pooled + acc[:, g * c:(g + 1) * c]
        pooled = pooled * inv_n                       # AvgPool1d(kernel_size=N)
        # Conv1d(d_model, d_model, k=1) == pooled @ W^T + bias  (tiny, once per tile)
        out = jnp.dot(pooled, w_ref[...], preferred_element_type=jnp.float32)
        out = out + b_ref[...]
        o_ref[...] = out[:, None, :].astype(o_ref.dtype)


def _choose_fold(n, c):
    """Smallest fold with (fold*c) % 128 == 0 that divides n; lane-dense fallback."""
    f_lane = 128 // math.gcd(c, 128)
    for mult in range(1, 9):
        f = f_lane * mult
        if f <= n and n % f == 0:
            return f
    best = 1
    for f in range(1, n + 1):
        if n % f == 0 and f * c <= 128:
            best = f
    return best


def _choose_tb(b, cap=32):
    """Largest divisor of b (<= cap) that still leaves >= 2 programs on the
    parallel grid axis when b >= 2 (keeps both v7x TensorCores busy)."""
    if b <= 1:
        return 1
    best = 1
    for t in range(1, min(b, cap) + 1):
        if b % t == 0 and b // t >= 2:
            best = t
    return best


def _largest_divisor(total, cap, step):
    """Largest multiple of `step` dividing `total`, <= cap (>= step)."""
    best = step
    t = step
    while t <= min(total, cap):
        if total % t == 0:
            best = t
        t += step
    return best


def image2text_gate(image_re, image_im, select_para, conv_w, conv_b):
    """image_re/image_im: (B, N, C); select_para: (N, C, 2);
    conv_w: (C_out, C_in, 1); conv_b: (C_out,). Returns (B, 1, C) float32."""
    B, N, C = image_re.shape
    assert select_para.shape == (N, C, 2)

    fold = _choose_fold(N, C)
    M = N // fold
    L = fold * C

    # Free, contiguous reshapes only (no interleave / stack): the kernel streams
    # the real and imaginary parts straight from their original HBM layout.
    img_re = image_re.reshape(B, M, L)
    img_im = image_im.reshape(B, M, L)

    # Gate (tiny: N*C*2 floats): real part and negated imaginary part, same layout.
    g_re = select_para[..., 0].reshape(M, L)
    g_im = (-select_para[..., 1]).reshape(M, L)

    w_t = jnp.transpose(conv_w[:, :, 0]).astype(jnp.float32)   # (C_in, C_out)
    bias = conv_b.reshape(1, C).astype(jnp.float32)

    # Robustness: for large, awkward M pad to a multiple of 8 (zero rows add 0 to
    # the sum) instead of using one huge full-dimension VMEM block.
    if M % 8 != 0 and M > 8:
        pad = (-M) % 8
        img_re = jnp.pad(img_re, ((0, 0), (0, pad), (0, 0)))
        img_im = jnp.pad(img_im, ((0, 0), (0, pad), (0, 0)))
        g_re = jnp.pad(g_re, ((0, pad), (0, 0)))
        g_im = jnp.pad(g_im, ((0, pad), (0, 0)))
        M = M + pad

    # ---- tile selection ----
    TB = _choose_tb(B)

    # ~4 MiB per streamed image block (re and im are separate double-buffered
    # streams): keeps the ~0.35us/step overhead negligible on v7x's 3.2 TB/s HBM
    # while staying well inside VMEM on every generation.
    img_block_budget = 4 * 1024 * 1024
    if M % 8 == 0:
        budget_rows = max(8, img_block_budget // (TB * L * 4))
        TM = _largest_divisor(M, budget_rows, 8)
    else:
        TM = M                           # only possible for tiny M (<= 8)
    SUB = 8 if TM % 8 == 0 else 1

    grid = (B // TB, M // TM)

    # Gate residency: keep it in VMEM (single DMA, zero re-streaming) unless big.
    gate_bytes = 2 * M * L * 4
    gate_resident = gate_bytes <= 8 * 1024 * 1024
    if gate_resident:
        gate_spec_re = pl.BlockSpec((M, L), lambda i, k: (0, 0))
        gate_spec_im = pl.BlockSpec((M, L), lambda i, k: (0, 0))
    else:
        gate_spec_re = pl.BlockSpec((TM, L), lambda i, k: (k, 0))
        gate_spec_im = pl.BlockSpec((TM, L), lambda i, k: (k, 0))
    slice_gate = gate_resident and (grid[1] > 1)

    kernel = functools.partial(
        image2text_gate_kernel,
        inv_n=1.0 / N, fold=fold, c=C, tm=TM, sub=SUB, slice_gate=slice_gate)

    # VMEM sized to actual need (double-buffered re+im blocks + gate + small bits),
    # clamped to [16, 32] MiB — comfortably under v7x's 64 MiB physical VMEM.
    img_block_bytes = TB * TM * L * 4
    vmem_need = 4 * img_block_bytes
    vmem_need += 2 * (gate_bytes if gate_resident else 2 * 2 * TM * L * 4)
    vmem_need += TB * SUB * L * 4 + C * C * 4 + 2 * TB * C * 4 + (1 << 20)
    vmem_limit = int(min(32 * 1024 * 1024, max(16 * 1024 * 1024, 2 * vmem_need)))

    return pl.pallas_call(
        kernel,
        out_shape=jax.ShapeDtypeStruct((B, 1, C), jnp.float32),
        grid_spec=pltpu.PrefetchScalarGridSpec(
            num_scalar_prefetch=0,
            grid=grid,
            in_specs=[
                pl.BlockSpec((TB, TM, L), lambda i, k: (i, k, 0)),   # image real stream
                pl.BlockSpec((TB, TM, L), lambda i, k: (i, k, 0)),   # image imag stream
                gate_spec_re,                                        # p_re
                gate_spec_im,                                        # -p_im
                pl.BlockSpec((C, C), lambda i, k: (0, 0)),           # conv weight (pre-T)
                pl.BlockSpec((1, C), lambda i, k: (0, 0)),           # bias
            ],
            out_specs=pl.BlockSpec((TB, 1, C), lambda i, k: (i, 0, 0)),
            scratch_shapes=[pltpu.VMEM((TB, SUB, L), jnp.float32)],  # running partial sums
        ),
        compiler_params=pltpu.CompilerParams(
            dimension_semantics=("parallel", "arbitrary"),
            vmem_limit_bytes=vmem_limit,
        ),
    )(img_re, img_im, g_re, g_im, w_t, bias)


def reference(image_re, image_im, select_para, conv_w, conv_b):
    # Pure-JAX reference mirroring the PyTorch module.
    p = select_para[..., 0] + 1j * select_para[..., 1]          # (N, C) complex
    img = (image_re + 1j * image_im) * p[None, :, :]            # (B, N, C) complex
    pooled = jnp.mean(jnp.real(img), axis=1)                    # (B, C)
    out = pooled @ conv_w[:, :, 0].T + conv_b[None, :]          # (B, C)
    return out[:, None, :]                                      # (B, 1, C)


if __name__ == "__main__":
    B, n, d_model = 2, 8, 32

    key = jax.random.PRNGKey(0)
    k_re, k_im, k_sel, k_w, k_b = jax.random.split(key, 5)

    image_re = jax.random.normal(k_re, (B, n, d_model), dtype=jnp.float32)
    image_im = jax.random.normal(k_im, (B, n, d_model), dtype=jnp.float32)

    # Deterministic synthetic parameters (shapes match the PyTorch __init__).
    select_para = jax.random.normal(k_sel, (n, d_model, 2), dtype=jnp.float32)
    conv_w = jax.random.normal(k_w, (d_model, d_model, 1), dtype=jnp.float32) * 0.1
    conv_b = jax.random.normal(k_b, (d_model,), dtype=jnp.float32) * 0.1

    out = image2text_gate(image_re, image_im, select_para, conv_w, conv_b)
    out = jax.block_until_ready(out)

    ref = reference(image_re, image_im, select_para, conv_w, conv_b)
    assert out.shape == (B, 1, d_model)
    assert jnp.allclose(out, ref, atol=1e-4, rtol=1e-4), "mismatch vs reference"

    print("KERNEL_OK")
</pallas_src>

<mosaic_0001>
module attributes {stable_mosaic.version = 11 : i64} {
  func.func @image2text_gate_kernel(%arg0: i32, %arg1: i32, %arg2: memref<1x2x128xf32, #tpu.memory_space<vmem>>, %arg3: memref<1x2x128xf32, #tpu.memory_space<vmem>>, %arg4: memref<2x128xf32, #tpu.memory_space<vmem>>, %arg5: memref<2x128xf32, #tpu.memory_space<vmem>>, %arg6: memref<32x32xf32, #tpu.memory_space<vmem>>, %arg7: memref<1x32xf32, #tpu.memory_space<vmem>>, %arg8: memref<1x1x32xf32, #tpu.memory_space<vmem>>, %arg9: memref<1x1x128xf32, #tpu.memory_space<vmem>>) attributes {dimension_semantics = [#tpu.dimension_semantics<parallel>, #tpu.dimension_semantics<arbitrary>], iteration_bounds = array<i64: 2, 1>, scalar_prefetch = 0 : i64, scratch_operands = 1 : i64, tpu.core_type = #tpu.core_type<tc>, window_params = [{transform_indices = @transform_0, window_bounds = array<i64: 1, 2, 128>}, {transform_indices = @transform_1, window_bounds = array<i64: 1, 2, 128>}, {pipeline_mode = #tpu.pipeline_mode<synchronous>, transform_indices = @transform_2, window_bounds = array<i64: 2, 128>}, {pipeline_mode = #tpu.pipeline_mode<synchronous>, transform_indices = @transform_3, window_bounds = array<i64: 2, 128>}, {pipeline_mode = #tpu.pipeline_mode<synchronous>, transform_indices = @transform_4, window_bounds = array<i64: 32, 32>}, {pipeline_mode = #tpu.pipeline_mode<synchronous>, transform_indices = @transform_5, window_bounds = array<i64: 1, 32>}, {transform_indices = @transform_6, window_bounds = array<i64: 1, 1, 32>}]} {
    %c0_i32 = arith.constant 0 : i32
    %0 = arith.cmpi eq, %arg1, %c0_i32 : i32
    %1 = arith.extui %0 : i1 to i32
    %c0_i32_0 = arith.constant 0 : i32
    %2 = arith.cmpi ne, %1, %c0_i32_0 : i32
    scf.if %2 {
      %cst_18 = arith.constant 0.000000e+00 : f32
      %20 = vector.broadcast %cst_18 : f32 to vector<1x1x128xf32>
      %c0_19 = arith.constant 0 : index
      %c0_20 = arith.constant 0 : index
      %c0_21 = arith.constant 0 : index
      %21 = vector.load %arg9[%c0_19, %c0_20, %c0_21] : memref<1x1x128xf32, #tpu.memory_space<vmem>>, vector<1x1x128xf32>
      tpu.vector_store %arg9[%c0_19, %c0_20, %c0_21], %20 {strides = array<i32>} : memref<1x1x128xf32, #tpu.memory_space<vmem>>, vector<1x1x128xf32>,
    } else {
    }
    %c0 = arith.constant 0 : index
    %c0_1 = arith.constant 0 : index
    %3 = vector.load %arg4[%c0, %c0_1] : memref<2x128xf32, #tpu.memory_space<vmem>>, vector<2x128xf32>
    %c0_2 = arith.constant 0 : index
    %c0_3 = arith.constant 0 : index
    %4 = vector.load %arg5[%c0_2, %c0_3] : memref<2x128xf32, #tpu.memory_space<vmem>>, vector<2x128xf32>
    %c0_4 = arith.constant 0 : index
    %c0_5 = arith.constant 0 : index
    %c0_6 = arith.constant 0 : index
    %5 = vector.load %arg2[%c0_4, %c0_5, %c0_6] : memref<1x2x128xf32, #tpu.memory_space<vmem>>, vector<1x2x128xf32>
    %6 = vector.shape_cast %3 : vector<2x128xf32> to vector<1x2x128xf32>
    %7 = arith.mulf %5, %6 : vector<1x2x128xf32>
    %c0_7 = arith.constant 0 : index
    %c0_8 = arith.constant 0 : index
    %c0_9 = arith.constant 0 : index
    %8 = vector.load %arg3[%c0_7, %c0_8, %c0_9] : memref<1x2x128xf32, #tpu.memory_space<vmem>>, vector<1x2x128xf32>
    %9 = vector.shape_cast %4 : vector<2x128xf32> to vector<1x2x128xf32>
    %10 = arith.mulf %8, %9 : vector<1x2x128xf32>
    %11 = arith.addf %7, %10 : vector<1x2x128xf32>
    %c0_10 = arith.constant 0 : index
    %c0_11 = arith.constant 0 : index
    %c0_12 = arith.constant 0 : index
    %12 = vector.load %arg9[%c0_10, %c0_11, %c0_12] : memref<1x1x128xf32, #tpu.memory_space<vmem>>, vector<1x1x128xf32>
    %cst = arith.constant dense<0.000000e+00> : vector<1x128xf32>
    %13 = vector.multi_reduction <add>, %11, %cst [1] : vector<1x2x128xf32> to vector<1x128xf32>
    %14 = vector.shape_cast %13 : vector<1x128xf32> to vector<1x1x128xf32>
    %15 = arith.addf %12, %14 : vector<1x1x128xf32>
    %c0_13 = arith.constant 0 : index
    %c0_14 = arith.constant 0 : index
    %c0_15 = arith.constant 0 : index
    %16 = vector.load %arg9[%c0_13, %c0_14, %c0_15] : memref<1x1x128xf32, #tpu.memory_space<vmem>>, vector<1x1x128xf32>
    tpu.vector_store %arg9[%c0_13, %c0_14, %c0_15], %15 {strides = array<i32>} : memref<1x1x128xf32, #tpu.memory_space<vmem>>, vector<1x1x128xf32>,
    %c0_i32_16 = arith.constant 0 : i32
    %17 = arith.cmpi eq, %arg1, %c0_i32_16 : i32
    %18 = arith.extui %17 : i1 to i32
    %c0_i32_17 = arith.constant 0 : i32
    %19 = arith.cmpi ne, %18, %c0_i32_17 : i32
    scf.if %19 {
      %c0_18 = arith.constant 0 : index
      %c0_19 = arith.constant 0 : index
      %c0_20 = arith.constant 0 : index
      %20 = vector.load %arg9[%c0_18, %c0_19, %c0_20] : memref<1x1x128xf32, #tpu.memory_space<vmem>>, vector<1x1x128xf32>
      %cst_21 = arith.constant dense<0.000000e+00> : vector<1x128xf32>
      %21 = vector.multi_reduction <add>, %20, %cst_21 [1] : vector<1x1x128xf32> to vector<1x128xf32>
      %22 = vector.extract_strided_slice %21 {offsets = [0, 0], sizes = [1, 32], strides = [1, 1]} : vector<1x128xf32> to vector<1x32xf32>
      %23 = vector.extract_strided_slice %21 {offsets = [0, 32], sizes = [1, 32], strides = [1, 1]} : vector<1x128xf32> to vector<1x32xf32>
      %24 = arith.addf %22, %23 : vector<1x32xf32>
      %25 = vector.extract_strided_slice %21 {offsets = [0, 64], sizes = [1, 32], strides = [1, 1]} : vector<1x128xf32> to vector<1x32xf32>
      %26 = arith.addf %24, %25 : vector<1x32xf32>
      %27 = vector.extract_strided_slice %21 {offsets = [0, 96], sizes = [1, 32], strides = [1, 1]} : vector<1x128xf32> to vector<1x32xf32>
      %28 = arith.addf %26, %27 : vector<1x32xf32>
      %cst_22 = arith.constant 1.250000e-01 : f32
      %29 = vector.broadcast %cst_22 : f32 to vector<1x32xf32>
      %30 = arith.mulf %28, %29 : vector<1x32xf32>
      %c0_23 = arith.constant 0 : index
      %c0_24 = arith.constant 0 : index
      %31 = vector.load %arg6[%c0_23, %c0_24] : memref<32x32xf32, #tpu.memory_space<vmem>>, vector<32x32xf32>
      %cst_25 = arith.constant dense<0.000000e+00> : vector<1x32xf32>
      %32 = tpu.matmul %30, %31, %cst_25 {dimension_numbers = #tpu.dot_dimension_numbers<[1], [0], [0], [1], [0, 0, 1, 1], [], []>} : vector<1x32xf32>, vector<32x32xf32>, vector<1x32xf32> -> vector<1x32xf32>
      %c0_26 = arith.constant 0 : index
      %c0_27 = arith.constant 0 : index
      %33 = vector.load %arg7[%c0_26, %c0_27] : memref<1x32xf32, #tpu.memory_space<vmem>>, vector<1x32xf32>
      %34 = arith.addf %32, %33 : vector<1x32xf32>
      %35 = vector.shape_cast %34 : vector<1x32xf32> to vector<1x1x32xf32>
      %c0_28 = arith.constant 0 : index
      %c0_29 = arith.constant 0 : index
      %c0_30 = arith.constant 0 : index
      %36 = vector.load %arg8[%c0_28, %c0_29, %c0_30] : memref<1x1x32xf32, #tpu.memory_space<vmem>>, vector<1x1x32xf32>
      tpu.vector_store %arg8[%c0_28, %c0_29, %c0_30], %35 {strides = array<i32>} : memref<1x1x32xf32, #tpu.memory_space<vmem>>, vector<1x1x32xf32>,
    } else {
    }
    return
  }
  func.func @transform_0(%arg0: i32, %arg1: i32) -> (i32, i32, i32) {
    %c0_i32 = arith.constant 0 : i32
    %c0_i32_0 = arith.constant 0 : i32
    return %arg0, %arg1, %c0_i32 : i32, i32, i32
  }
  func.func @transform_1(%arg0: i32, %arg1: i32) -> (i32, i32, i32) {
    %c0_i32 = arith.constant 0 : i32
    %c0_i32_0 = arith.constant 0 : i32
    return %arg0, %arg1, %c0_i32 : i32, i32, i32
  }
  func.func @transform_2(%arg0: i32, %arg1: i32) -> (i32, i32) {
    %c0_i32 = arith.constant 0 : i32
    %c0_i32_0 = arith.constant 0 : i32
    %c0_i32_1 = arith.constant 0 : i32
    return %c0_i32, %c0_i32_0 : i32, i32
  }
  func.func @transform_3(%arg0: i32, %arg1: i32) -> (i32, i32) {
    %c0_i32 = arith.constant 0 : i32
    %c0_i32_0 = arith.constant 0 : i32
    %c0_i32_1 = arith.constant 0 : i32
    return %c0_i32, %c0_i32_0 : i32, i32
  }
  func.func @transform_4(%arg0: i32, %arg1: i32) -> (i32, i32) {
    %c0_i32 = arith.constant 0 : i32
    %c0_i32_0 = arith.constant 0 : i32
    %c0_i32_1 = arith.constant 0 : i32
    return %c0_i32, %c0_i32_0 : i32, i32
  }
  func.func @transform_5(%arg0: i32, %arg1: i32) -> (i32, i32) {
    %c0_i32 = arith.constant 0 : i32
    %c0_i32_0 = arith.constant 0 : i32
    %c0_i32_1 = arith.constant 0 : i32
    return %c0_i32, %c0_i32_0 : i32, i32
  }
  func.func @transform_6(%arg0: i32, %arg1: i32) -> (i32, i32, i32) {
    %c0_i32 = arith.constant 0 : i32
    %c0_i32_0 = arith.constant 0 : i32
    %c0_i32_1 = arith.constant 0 : i32
    return %arg0, %c0_i32, %c0_i32_0 : i32, i32, i32
  }
}

</mosaic_0001>

<bundles_post_ra>
// kernel: tpu_custom_call.1
= control target key start
LH: loop header
LB: loop body
LE: loop exit
PB: predicated region body
PF: predicated region fallthrough
CT: control target
= control target key end

     0   :  { %s1187_s0 = inlined_call_operand.hbm [shape: f32[2,2,128], index: 0, kind: input, shape index: {}]   ;;  %s1188_s1 = inlined_call_operand.hbm [shape: f32[2,2,128], index: 1, kind: input, shape index: {}]   ;;  %s1189_s2 = inlined_call_operand.vmem [shape: f32[2,128], index: 2, kind: input, shape index: {}]   ;;  %s1190_s3 = inlined_call_operand.vmem [shape: f32[2,128], index: 3, kind: input, shape index: {}]   ;;  %s1191_s4 = inlined_call_operand.hbm [shape: f32[32,32], index: 4, kind: input, shape index: {}]   ;;  %s1192_s5 = inlined_call_operand.vmem [shape: f32[1,32], index: 5, kind: input, shape index: {}]   ;;  %s1193_s6 = inlined_call_operand.hbm [shape: f32[2,1,32], index: 6, kind: output, shape index: {}]  }
   0x1   :  { %1201 = sst [smem:[#allocation18_spill]] %s1191_s4 }
   0x2   :  { %11 = vsyncpa [#allocation4], 0 }
   0x3   :  { %13 = vsyncpa [#allocation4 + $0x1], 0 }
   0x4   :  { %14 = vsyncpa [#allocation7], 0 }
   0x5   :  { %16 = vsyncpa [#allocation7 + $0x1], 0 }
   0x6   :  { %17 = vsyncpa [#allocation5], 0 }
   0x7   :  { %19 = vsyncpa [#allocation5 + $0x1], 0  ;;  %s931_s21 = smov 0   ;;  %s933_s22 = smov 0  }
   0x8   :  { %s935_s23 = smov 0   ;;  %s937_s24 = smov 0  }
   0x9   :  { %s939_s25 = smov 0   ;;  %s941_s26 = smov 0  }
   0xa LB: > { %1202 = sst [smem:[#allocation14_spill]] %s870_s23  ;;  %s962_s27 = sadd.s32 4294967295, %s882_s26   ;;  %s882_s26 = sphi %s941_s26, %s25_s26   ;;  %s878_s25 = sphi %s939_s25, %s1225_s25   ;;  %s874_s24 = sphi %s937_s24, %s1224_s24   ;;  %s870_s23 = sphi %s935_s23, %s1223_s23   ;;  %s866_s22 = sphi %s933_s22, %s1227_s22   ;;  %s862_s21 = sphi %s931_s21, %s1226_s21  }
   0xb   : > { %1203 = sst [smem:[#allocation15_spill]] %s878_s25  ;;  %s580_s28 = sadd.s32 4294967294, %s882_s26  }
   0xc   : > { %p59_p0 = scmp.ne.s32.totalorder %s866_s22, %s862_s21  ;;  %p1194_p1 = scmp.eq.s32.totalorder %s962_s27, 0 }
   0xd   : > { %p201_p3 = scmp.eq.s32.totalorder %s580_s28, 1  ;;  %p581_p5 = scmp.ge.s32.totalorder %s882_s26, 1 }
   0xe   : > { %p971_p4 = por %p1194_p1, %p59_p0  ;;  %p208_p7 = scmp.lt.s32.totalorder %s882_s26, 3 }
   0xf   : > { %p976_p6 = por %p201_p3, %p59_p0  ;;  %s884_s8 = smov [#allocation8]  }
  0x10   : > { %s1204_s29 = scalar_select %p971_p4, 1, 0 }
  0x11   : > { %s1205_s30 = scalar_select %p976_p6, 1, 0 }
  0x12   : > { %p981_p8 = pnand %p581_p5, %p208_p7  ;;  %s226_s9 = sshll.u32 %s884_s8, 4  ;;  %s227_s9 = int_to_ptr.vmem [resolvable:$true] %s226_s9 }
  0x13   : > { %s37_s11 = sadd.s32 1, %s878_s25  ;;  %s1208_s4 = sld [smem:[#allocation18_spill]] }
  0x14   : > { %s1206_s7 = scalar_select %p981_p8, 1, 0 }
  0x15   : > { %p628_p9 = pneg %p981_p8 }
  0x17   : > { %p990_p11 = pnand %p628_p9, %p1194_p1 }
  0x19   : > { %s704_s14 = scalar_lea.hbm %s1208_s4, 512  ;;  %p706_p13 = pneg %p990_p11 }
  0x1a   : > { %p705_p12 = scmp.ne.s32.totalorder %s1208_s4, %s704_s14  ;;  %p711_p5 = scmp.lt.u32.totalorder %s704_s14, %s1208_s4 }
  0x1c   : > { %p707_p0 = pnand %p706_p13, %p705_p12 }
  0x1e   : > { %p708_p3 = pneg %p707_p0 }
  0x20   : > { %p713_p7 = pnand %p711_p5, %p708_p3 }
  0x22   : > { %716 = shalt.err (!%p713_p7)
}
  0x23   : > { %s717_s19 = scalar_lea.vmem %s227_s9, 512  ;;  %p725_p2 = scmp.lt.s32.totalorder %s227_s9, %s227_s9 }
  0x24   : > { %p718_p9 = scmp.ne.s32.totalorder %s227_s9, %s717_s19  ;;  %p726_p6 = scmp.lt.s32.totalorder %s717_s19, %s717_s19 }
  0x26   : > { %p720_p10 = pnand %p718_p9, %p706_p13  ;;  %p727_p4 = por %p726_p6, %p725_p2 }
  0x28   : > { %p721_p1 = pneg %p720_p10 }
  0x2a   : > { %p728_p8 = pnand %p727_p4, %p721_p1 }
  0x2c   : > { %731 = shalt.err (!%p728_p8)
}
  0x2d   : > { %s885_s20 = smov 128   ;;  %s886_s28 = smov 8  }
  0x2e   : > { %631 = dma.hbm_to_vmem [thread:$0]  (!%p990_p11), %s1208_s4, 512, %s227_s9, [#allocation7], %s885_s20, %s885_s20, %s886_s28  }
  0x2f   : > { %p39_p1 = scmp.ge.s32.totalorder %s37_s11, 2  ;;  %s46_s13 = sadd.s32 1, %s870_s23 }
  0x30   : > { %p53_p2 = scmp.ne.s32.totalorder %s870_s23, %s866_s22  ;;  %p54_p4 = scmp.eq.s32.totalorder %s882_s26, 0 }
  0x31   : > { %s1229_s11 = smov (%p39_p1, %s37_s11), 0  ;;  %p1211_p8 = scmp.eq.s32.totalorder %s962_s27, 1 }
  0x32   : > { %1209 = sst [smem:[#allocation16_spill]] %s1229_s11  ;;  %p1017_p6 = por %p54_p4, %p53_p2 }
  0x33   : > { %p1023_p10 = por %p1211_p8, %p53_p2  ;;  %s41_s15 = ssub.s32 %s878_s25, %s1229_s11 }
  0x34   : > { %p644_p11 = scmp.lt.s32.totalorder %s882_s26, 2  ;;  %p44_p12 = scmp.eq.s32.totalorder %s41_s15, 0 }
  0x35   : > { %s1212_s10 = scalar_select %p1023_p10, 1, 0 }
  0x36   : > { %s243_s9 = sand.u32 1, %s870_s23   ;;  %s585_s18 = sshll.u32 %s878_s25, 5 }
  0x37   : > { %s1031_s16 = sshll.u32 %s243_s9, 1  ;;  %s1040_s28 = scalar_lea.hbm %s1187_s0, %s585_s18 }
  0x38   : > { %s1034_s17 = scalar_select %p44_p12, %s870_s23, %s46_s13  }
  0x39   : > { %s247_s8 = scalar_lea.vmem [#allocation3], %s1031_s16  ;;  %p1047_p13 = pnand %p644_p11, %p1017_p6 }
  0x3a   : > { %1213 = sst [smem:[#allocation17_spill]] %s1034_s17  ;;  %s255_s12 = sshll.u32 %s247_s8, 4  ;;  %s1043_s12 = int_to_ptr.vmem [resolvable:$true] %s255_s12 }
  0x3b   : > { %s1054_s19 = scalar_lea.hbm %s1188_s1, %s585_s18  ;;  %s262_s20 = sand.u32 1, %s882_s26  }
  0x3c   : > { %s244_s11 = scalar_lea.sflag [#allocation4], %s243_s9  ;;  %s732_s25 = scalar_lea.hbm %s1040_s28, 32 }
  0x3d   : > { %p733_p0 = scmp.ne.s32.totalorder %s1040_s28, %s732_s25  ;;  %p734_p3 = pneg %p1047_p13 }
  0x3e   : > { %s737_s17 = scalar_lea.hbm %s1187_s0, 64  ;;  %p738_p9 = scmp.lt.u32.totalorder %s1040_s28, %s1187_s0 }
  0x3f   : > { %p735_p5 = pnand %p734_p3, %p733_p0  ;;  %p739_p1 = scmp.lt.u32.totalorder %s737_s17, %s732_s25 }
  0x40   : > { %p741_p4 = scmp.lt.u32.totalorder %s732_s25, %s1040_s28 }
  0x41   : > { %p736_p7 = pneg %p735_p5  ;;  %p740_p2 = por %p739_p1, %p738_p9 }
  0x43   : > { %p742_p6 = por %p741_p4, %p740_p2 }
  0x45   : > { %p743_p8 = pnand %p742_p6, %p736_p7 }
  0x47   : > { %746 = shalt.err (!%p743_p8)
}
  0x48   : > { %s747_s9 = scalar_lea.vmem %s1043_s12, 32  ;;  %s887_s18 = smov [#allocation3]  }
  0x49   : > { %p748_p11 = scmp.ne.s32.totalorder %s1043_s12, %s747_s9  ;;  %s752_s13 = sshll.u32 %s887_s18, 4  ;;  %s753_s13 = int_to_ptr.vmem [resolvable:$false] %s752_s13 }
  0x4a   : > { %s754_s23 = scalar_lea.vmem %s753_s13, 64  ;;  %p755_p5 = scmp.lt.s32.totalorder %s1043_s12, %s753_s13 }
  0x4b   : > { %p750_p12 = pnand %p748_p11, %p734_p3  ;;  %p756_p9 = scmp.lt.s32.totalorder %s754_s23, %s747_s9 }
  0x4d   : > { %p751_p0 = pneg %p750_p12  ;;  %p757_p1 = por %p756_p9, %p755_p5 }
  0x4f   : > { %p758_p2 = pnand %p757_p1, %p751_p0 }
  0x51   : > { %761 = shalt.err (!%p758_p2)
}
  0x52   : > { %635 = dma.hbm_to_vmem [thread:$0]  (!%p1047_p13), %s1040_s28, 32, %s1043_s12, %s244_s11  }
  0x53   : > { %s266_s25 = scalar_lea.vmem [#allocation6], %s1031_s16  ;;  %s263_s14 = scalar_lea.sflag [#allocation7], %s262_s20 }
  0x54   : > { %s274_s17 = sshll.u32 %s266_s25, 4  ;;  %s762_s8 = scalar_lea.hbm %s1054_s19, 32  ;;  %s275_s17 = int_to_ptr.vmem [resolvable:$true] %s274_s17 }
  0x55   : > { %p763_p7 = scmp.ne.s32.totalorder %s1054_s19, %s762_s8  ;;  %s767_s18 = scalar_lea.hbm %s1188_s1, 64 }
  0x56   : > { %p768_p8 = scmp.lt.u32.totalorder %s1054_s19, %s1188_s1  ;;  %p769_p11 = scmp.lt.u32.totalorder %s767_s18, %s762_s8 }
  0x57   : > { %p765_p4 = pnand %p763_p7, %p734_p3  ;;  %p771_p0 = scmp.lt.u32.totalorder %s762_s8, %s1054_s19 }
  0x58   : > { %p770_p12 = por %p769_p11, %p768_p8 }
  0x59   : > { %p766_p6 = pneg %p765_p4 }
  0x5a   : > { %p772_p5 = por %p771_p0, %p770_p12 }
  0x5c   : > { %p773_p9 = pnand %p772_p5, %p766_p6 }
  0x5e   : > { %776 = shalt.err (!%p773_p9)
}
  0x5f   : > { %s777_s11 = scalar_lea.vmem %s275_s17, 32  ;;  %s888_s16 = smov [#allocation6]  }
  0x60   : > { %p778_p1 = scmp.ne.s32.totalorder %s275_s17, %s777_s11  ;;  %s782_s28 = sshll.u32 %s888_s16, 4  ;;  %s783_s28 = int_to_ptr.vmem [resolvable:$false] %s782_s28 }
  0x61   : > { %s784_s12 = scalar_lea.vmem %s783_s28, 64  ;;  %p785_p4 = scmp.lt.s32.totalorder %s275_s17, %s783_s28 }
  0x62   : > { %p780_p2 = pnand %p778_p1, %p734_p3  ;;  %p786_p10 = scmp.lt.s32.totalorder %s784_s12, %s777_s11 }
  0x64   : > { %p781_p7 = pneg %p780_p2  ;;  %p787_p8 = por %p786_p10, %p785_p4 }
  0x66   : > { %p788_p11 = pnand %p787_p8, %p781_p7 }
  0x68   : > { %791 = shalt.err (!%p788_p11)
}
  0x69   : > { %638 = dma.hbm_to_vmem [thread:$0]  (!%p1047_p13), %s1054_s19, 32, %s275_s17, %s263_s14  }
  0x6a   : > { %p1215_p6 = scmp.ne.s32.totalorder %s1206_s7, 0 }
  0x6b   : > { %s1107_s20 = sand.u32 (!%p1215_p6), 1, %s866_s22   ;;  %p1216_p3 = scmp.ne.s32.totalorder (!%p1215_p6), %s1204_s29, 0 }
  0x6c   : > { %283 = sbr.rel (%p1215_p6) target bundleno = 505 (0x1f9), region = 44  ;;  %s589_s25 = sshll.u32 (!%p1215_p6), %s1107_s20, 1 }
  0x6d   : > { %s286_s8 = scalar_lea.sflag (!%p1215_p6), [#allocation4], %s1107_s20  ;;  %s289_s4 = scalar_lea.vmem (!%p1215_p6), [#allocation3], %s589_s25 }
  0x73   : > { %845 = dma.done.wait (%p1216_p3), %s286_s8, 32  }
  0x74   : > { %847 = vsyncadd (%p1216_p3), %s286_s8, 4294967264  ;;  %s294_s15 = sand.u32 1, %s962_s27   ;;  %s298_s7 = scalar_lea.vmem [#allocation6], %s589_s25 }
  0x75   : > { %s295_s19 = scalar_lea.sflag [#allocation7], %s294_s15 }
  0x76   : > { %849 = dma.done.wait (%p1216_p3), %s295_s19, 32  }
  0x77   : > { %851 = vsyncadd (%p1216_p3), %s295_s19, 4294967264  ;;  %p1217_p10 = scmp.eq.s32.totalorder %s962_s27, 0 }
  0x79   : > { %853 = dma.done.wait (%p1217_p10), [#allocation7], 512   ;;  %p1218_p13 = pmov %p1217_p10 }
  0x7a   : > { %v889_v0 = vmov 0.0   ;;  %v340_v1 = vld [vmem:[%s1189_s2] sm:$0x3]  ;;  %v344_v5 = vld [vmem:[%s298_s7] sm:$0x3]  ;;  %vm348_vm0 = vcmask 1041408  }
  0x7b   : > { %855 = vsyncadd (%p1218_p13), [#allocation7], 4294966784  ;;  %339 = vst [vmem:[#allocation2] sm:$0x1] %v889_v0  ;;  %v341_v2 = vld [vmem:[%s1190_s3] sm:$0x3] }
  0x7c   : > { %v342_v3 = vld [vmem:[%s289_s4] sm:$0x3]  ;;  %v345_v6 = vmul.f32 %v344_v5, %v341_v2  ;;  %v377_v15 = vld [vmem:[#allocation8] sm:$0xff]  ;;  %v378_v16 = vld [vmem:[#allocation8 + $0x8] sm:$0xff]  ;;  %v890_v18 = vmov 0.0|0.0   ;;  %vm891_vm1 = vmmov 0  }
  0x7d   : > { %v343_v4 = vmul.f32 %v342_v3, %v340_v1  ;;  %612 = vmatprep.subr.bf16.mxu0 %v890_v18  ;;  %v613_v19 = vpack.c.bf16 %v378_v16, %v377_v15  ;;  %v379_v21 = vld [vmem:[#allocation8 + $0x10] sm:$0xff]  ;;  %v380_v22 = vld [vmem:[#allocation8 + $0x18] sm:$0xff]  ;;  %609 = vmatprep.mubr.msk.f32.mxu0 %vm891_vm1, %v889_v0  ;;  %s892_s27 = smov 96   ;;  %s893_s29 = smov 32   ;;  %vm382_vm2 = vcmask 261120   ;;  %vm456_vm3 = vcmask 253952  }
  0x7e   : > { %v616_v23 = vpack.c.bf16 %v380_v22, %v379_v21  ;;  %s894_s13 = smov 64   ;;  %v381_v32 = vld [vmem:[%s1192_s5] sm:$0x1]  ;;  %s593_s16 = sshll.u32 %s874_s24, 4 }
  0x7f   : > { %v346_v7 = vadd.f32 %v345_v6, %v343_v4  ;;  %614 = vmatpush3.bf16.msra.mxu0 %v613_v19  ;;  %s334_s28 = scalar_lea.vmem [#allocation9], %s1107_s20  ;;  %s1138_s4 = scalar_lea.hbm %s1193_s6, %s593_s16 }
  0x80   : > { %615 = vmatprep.subr.bf16.mxu0 %v890_v18  ;;  %s471_s12 = sshll.u32 %s334_s28, 4  ;;  %s459_s15 = scalar_lea.sflag [#allocation5], %s1107_s20  ;;  %s1140_s12 = int_to_ptr.vmem [resolvable:$true] %s471_s12 }
  0x81   : > { %v349_v8 = vsel %vm348_vm0, %v346_v7, 0.0  ;;  %s792_s19 = scalar_lea.vmem %s1140_s12, 16  ;;  %p1219_p0 = scmp.ne.s32.totalorder %s1212_s10, 0 }
  0x82   : > { %v350_v9 = vrot.slane %v349_v8, 4  ;;  %v347_v14 = vld [vmem:[#allocation2] sm:$0x1]  ;;  %p793_p12 = scmp.ne.s32.totalorder %s1140_s12, %s792_s19  ;;  %s895_s24 = smov [#allocation9]  }
  0x83   : > { %617 = vmatpush3.bf16.msra.mxu0 %v616_v23  ;;  %s796_s7 = sshll.u32 %s895_s24, 4  ;;  %s797_s7 = int_to_ptr.vmem [resolvable:$false] %s796_s7 }
  0x84   : > { %v351_v10 = vadd.f32 %v350_v9, %v349_v8  ;;  %p794_p5 = pnand %p793_p12, %p1219_p0  ;;  %s798_s17 = scalar_lea.vmem %s797_s7, 32 }
  0x85   : > { %p799_p1 = scmp.lt.s32.totalorder %s1140_s12, %s797_s7  ;;  %p800_p2 = scmp.lt.s32.totalorder %s798_s17, %s792_s19 }
  0x86   : > { %v352_v11 = vrot.slane %v351_v10, 2  ;;  %p795_p9 = pneg %p794_p5 }
  0x87   : > { %p801_p7 = por %p800_p2, %p799_p1 }
  0x88   : > { %v353_v12 = vadd.f32 %v352_v11, %v351_v10 }
  0x89   : > { %p802_p4 = pnand %p801_p7, %p795_p9 }
  0x8a   : > { %v354_v13 = vrot.slane %v353_v12, 1 }
  0x8c   : > { %v355_v17 = vadd.f32 %v354_v13, %v353_v12 }
  0x8e   : > { %v356_v20 = vadd.f32 %v355_v17, %v347_v14 }
  0x90   : > { %357 = vst [vmem:[#allocation2] sm:$0x1] %v356_v20 }
  0x97   : > { %v361_v24 = vld [vmem:[#allocation2] sm:$0x1] }
  0x98   : > { %364 = vrot.lane.b32.xlu0 %v361_v24, %s892_s27  ;;  %372 = vrot.lane.b32.xlu1 %v361_v24, %s893_s29 }
  0x9c   : > { %368 = vrot.lane.b32.xlu0 %v361_v24, %s894_s13 }
 0x10a   : > { %v365_v25 = vpop.permute.xlu0 %364  ;;  %v373_v28 = vpop.permute.xlu1 %372 }
 0x10b   : > { %v367_v26 = vadd.f32 %v365_v25, %v361_v24 }
 0x10e   : > { %v369_v27 = vpop.permute.xlu0 %368 }
 0x10f   : > { %v371_v29 = vadd.f32 %v369_v27, %v367_v26 }
 0x111   : > { %v375_v30 = vadd.f32 %v373_v28, %v371_v29 }
 0x113   : > { %v376_v31 = vmul.f32 0.125, %v375_v30 }
 0x115   : > { %610 = vmatmul.mubr.msk.f32.vlgmr.msra.gmra.mrb[0].mxu0 %vm382_vm2, %v376_v31 }
 0x1e8   : > { %v452_v33 = vpop.f32.mrb[0].mxu0 }
 0x1e9   : > { %v453_v34 = vadd.f32 %v452_v33, %v381_v32  ;;  %v611_v35 = vpop.f32.mrb[1].mxu0 }
 0x1eb   : > { %457 = vst.msk [vmem:[%s334_s28] sm:$0x1] %vm456_vm3, %v453_v34 }
 0x1ec   : > { %805 = shalt.err (!%p802_p4)
}
 0x1ed   : > { %s806_s20 = scalar_lea.hbm %s1138_s4, 16  ;;  %s810_s18 = scalar_lea.hbm %s1193_s6, 32 }
 0x1ee   : > { %p807_p8 = scmp.ne.s32.totalorder %s1138_s4, %s806_s20  ;;  %p811_p3 = scmp.lt.u32.totalorder %s1138_s4, %s1193_s6 }
 0x1ef   : > { %p812_p10 = scmp.lt.u32.totalorder %s810_s18, %s806_s20  ;;  %p814_p12 = scmp.lt.u32.totalorder %s806_s20, %s1138_s4 }
 0x1f0   : > { %p808_p11 = pnand %p807_p8, %p1219_p0 }
 0x1f1   : > { %p813_p13 = por %p812_p10, %p811_p3 }
 0x1f2   : > { %p809_p6 = pneg %p808_p11 }
 0x1f3   : > { %p815_p5 = por %p814_p12, %p813_p13 }
 0x1f5   : > { %p816_p9 = pnand %p815_p5, %p809_p6 }
 0x1f7   : > { %819 = shalt.err (!%p816_p9)
}
 0x1f8   : > { %626 = dma.vmem_to_hbm [thread:$0]  (%p1219_p0), %s1140_s12, 16, %s1138_s4, %s459_s15  }
 0x1f9 PF: > { %s483_s13 = sand.u32 1, %s862_s21   ;;  %p1220_p1 = scmp.ne.s32.totalorder %s1205_s30, 0 }
 0x1fa   : > { %p1221_p2 = scmp.ge.s32.totalorder %s882_s26, 2  ;;  %s484_s23 = scalar_lea.sflag [#allocation5], %s483_s13 }
 0x1fc   : > { %p640_p7 = pnand %p1221_p2, %p1220_p1 }
 0x1fe   : > { %857 = dma.done.wait (!%p640_p7), %s484_s23, 16  }
 0x1ff   : > { %859 = vsyncadd (!%p640_p7), %s484_s23, 4294967280  ;;  %s25_s26 = sadd.s32 1, %s882_s26   ;;  %s1222_s11 = sld [smem:[#allocation14_spill]] }
 0x200   : > { %p22_p4 = scmp.ge.s32.totalorder %s25_s26, 4   ;;  %s1223_s23 = sld [smem:[#allocation17_spill]] }
 0x201   : > { %s1224_s24 = sld [smem:[#allocation15_spill]]  ;;  %s1225_s25 = sld [smem:[#allocation16_spill]] }
 0x202   : > { %s1226_s21 = smov %s866_s22  ;;  %24 = sbr.rel (!%p22_p4) target bundleno = 10 (0xa), region = 114 }
 0x205   : > { %s1227_s22 = smov %s1222_s11 }
 0x209   :  { %488 = vsyncpa [#allocation4], 1 }
 0x20a   :  { %490 = vsyncpa [#allocation4 + $0x1], 1 }
 0x20b   :  { %491 = vsyncpa [#allocation7], 1 }
 0x20c   :  { %493 = vsyncpa [#allocation7 + $0x1], 1 }
 0x20d   :  { %494 = vsyncpa [#allocation5], 1 }
 0x20e   :  { %496 = vsyncpa [#allocation5 + $0x1], 1 }

</bundles_post_ra>
